<compile_context>
chip_gen: v7x
topology: tpu7x:2x2x1
jax: 0.10.0
libtpu: 0.0.40
codegen_flags: <defaults>
</compile_context>

<pallas_src>
import functools

import jax
import jax.numpy as jnp
from jax.experimental import pallas as pl
from jax.experimental.pallas import tpu as pltpu


def _sdpa_kernel(*refs, scale, has_prev, amask_mode, has_kpm, return_scores,
                 mask_value):
    it = iter(refs)
    q_ref = next(it)                                          # (TB, Q, Dk)
    k_ref = next(it)                                          # (TB, Dk, S)
    v_ref = next(it)                                          # (TB, S, Dv)
    prev_ref = next(it) if has_prev else None                 # (TB, Q, S) f32
    amask_ref = next(it) if amask_mode is not None else None  # (1, Q, S)
    kpm_ref = next(it) if has_kpm else None                   # (TB, 1, S) i8
    out_ref = next(it)                                        # (TB, Q, Dv)
    attn_ref = next(it)                                       # (TB, Q, S) f32
    scores_ref = next(it) if return_scores else None          # (TB, Q, S) f32

    q = q_ref[...]
    k = k_ref[...]
    v = v_ref[...]

    # attn_scores = (q @ k) * scale (+ prev) (+ additive mask); f32 accumulation.
    scores = jnp.einsum("bqd,bds->bqs", q, k,
                        preferred_element_type=jnp.float32) * scale
    if has_prev:
        scores = scores + prev_ref[...].astype(jnp.float32)
    if amask_mode == "additive":
        scores = scores + amask_ref[...].astype(jnp.float32)

    # Fused boolean masking (attn_mask OR key_padding_mask) -> a single select.
    mask = None
    if amask_mode == "bool":
        mask = amask_ref[...] != 0
    if has_kpm:
        kmask = kpm_ref[...] != 0
        mask = kmask if mask is None else (mask | kmask)
    if mask is not None:
        scores = jnp.where(mask, mask_value, scores)

    if return_scores:
        scores_ref[...] = scores.astype(scores_ref.dtype)

    # softmax over the key axis, kept in f32 (EUP exp, XLU reductions).
    m = jnp.max(scores, axis=-1, keepdims=True)
    e = jnp.exp(scores - m)
    denom = jnp.sum(e, axis=-1, keepdims=True)
    attn = e * pl.reciprocal(denom, approx=False)
    attn_ref[...] = attn.astype(attn_ref.dtype)

    # output = attn @ v   (attn_dropout == 0.0 -> identity)
    # TODO(synk): training-mode nn.Dropout on attention weights not implemented.
    out = jnp.einsum("bqs,bsd->bqd", attn.astype(v.dtype), v,
                     preferred_element_type=jnp.float32)
    out_ref[...] = out.astype(out_ref.dtype)


def scaled_dot_product_attention(q, k, v, scale, prev=None,
                                 key_padding_mask=None, attn_mask=None,
                                 *, res_attention=False,
                                 matmul_dtype=None, block_heads=None,
                                 mask_value=-jnp.inf,
                                 vmem_budget_bytes=24 * 1024 * 1024):
    """Pallas TPU forward of PatchTST `_ScaledDotProductAttention`.

    q: [bs, H, Q, Dk], k: [bs, H, Dk, S], v: [bs, H, S, Dv]
    prev: [bs, H, Q, S] or None
    key_padding_mask: [bs, S] bool or None
    attn_mask: [1, Q, S] bool (masked_fill path) / float (additive) or None
    scale: static Python float (lsa=False nn.Parameter, head_dim ** -0.5)
    matmul_dtype: dtype for MXU operands (e.g. jnp.bfloat16 on v6e/v7x);
                  softmax and accumulation stay f32.  Default: q.dtype.
    """
    bs, H, Q, Dk = q.shape
    S = k.shape[-1]
    Dv = v.shape[-1]
    BH = bs * H
    out_dtype = q.dtype
    if matmul_dtype is None:
        matmul_dtype = q.dtype

    has_prev = prev is not None
    has_kpm = key_padding_mask is not None
    return_scores = bool(res_attention)

    amask_mode = None
    if attn_mask is not None:
        if (jnp.issubdtype(attn_mask.dtype, jnp.bool_)
                or jnp.issubdtype(attn_mask.dtype, jnp.integer)):
            amask_mode = "bool"
        else:
            amask_mode = "additive"

    # ---- heads per grid step -------------------------------------------------
    # Short grid (amortize per-step overhead); even-length so v7x's two
    # TensorCores each take half; shrink only if the double-buffered per-step
    # VMEM footprint would exceed the budget.
    mxu_itm = jnp.dtype(matmul_dtype).itemsize
    out_itm = jnp.dtype(out_dtype).itemsize
    per_head_bytes = (Q * Dk + Dk * S + S * Dv) * mxu_itm   # q, k, v tiles
    per_head_bytes += Q * S * 4                             # attn weights (f32)
    per_head_bytes += Q * Dv * out_itm                      # output tile
    if has_prev:
        per_head_bytes += Q * S * 4
    if return_scores:
        per_head_bytes += Q * S * 4
    if has_kpm:
        per_head_bytes += S
    if amask_mode is not None:
        per_head_bytes += Q * S                             # shared, amortized

    if block_heads is None:
        TB = BH // 2 if (BH % 2 == 0 and BH >= 2) else BH
        # 2x for BlockSpec double-buffering of every pipelined stream.
        while TB > 1 and 2 * TB * per_head_bytes > vmem_budget_bytes:
            TB -= 1
            while BH % TB:
                TB -= 1
    else:
        TB = block_heads
    assert BH % TB == 0, "block_heads must divide bs * n_heads"
    n_steps = BH // TB

    qf = q.reshape(BH, Q, Dk).astype(matmul_dtype)
    kf = k.reshape(BH, Dk, S).astype(matmul_dtype)
    vf = v.reshape(BH, S, Dv).astype(matmul_dtype)

    inputs = [qf, kf, vf]
    in_specs = [
        pl.BlockSpec((TB, Q, Dk), lambda i: (i, 0, 0)),
        pl.BlockSpec((TB, Dk, S), lambda i: (i, 0, 0)),
        pl.BlockSpec((TB, S, Dv), lambda i: (i, 0, 0)),
    ]

    if has_prev:
        inputs.append(prev.reshape(BH, Q, S).astype(jnp.float32))
        in_specs.append(pl.BlockSpec((TB, Q, S), lambda i: (i, 0, 0)))

    if amask_mode == "bool":
        inputs.append(attn_mask.reshape(1, Q, S).astype(jnp.int8))
        in_specs.append(pl.BlockSpec((1, Q, S), lambda i: (0, 0, 0)))
    elif amask_mode == "additive":
        inputs.append(attn_mask.reshape(1, Q, S).astype(jnp.float32))
        in_specs.append(pl.BlockSpec((1, Q, S), lambda i: (0, 0, 0)))

    if has_kpm:
        kpm = jnp.broadcast_to(
            key_padding_mask.reshape(bs, 1, 1, S).astype(jnp.int8),
            (bs, H, 1, S)).reshape(BH, 1, S)
        inputs.append(kpm)
        in_specs.append(pl.BlockSpec((TB, 1, S), lambda i: (i, 0, 0)))

    out_shapes = [
        jax.ShapeDtypeStruct((BH, Q, Dv), out_dtype),     # output
        jax.ShapeDtypeStruct((BH, Q, S), jnp.float32),    # attn_weights
    ]
    out_specs = [
        pl.BlockSpec((TB, Q, Dv), lambda i: (i, 0, 0)),
        pl.BlockSpec((TB, Q, S), lambda i: (i, 0, 0)),
    ]
    if return_scores:
        out_shapes.append(jax.ShapeDtypeStruct((BH, Q, S), jnp.float32))
        out_specs.append(pl.BlockSpec((TB, Q, S), lambda i: (i, 0, 0)))

    kernel = functools.partial(
        _sdpa_kernel, scale=float(scale), has_prev=has_prev,
        amask_mode=amask_mode, has_kpm=has_kpm,
        return_scores=return_scores, mask_value=mask_value)

    in_bytes = sum(int(x.size) * x.dtype.itemsize for x in inputs)
    out_bytes = sum(
        int(jnp.prod(jnp.array(s.shape))) * jnp.dtype(s.dtype).itemsize
        for s in out_shapes)
    cost = pl.CostEstimate(
        flops=2 * BH * Q * S * (Dk + Dv),
        transcendentals=BH * Q * S,
        bytes_accessed=in_bytes + out_bytes)

    results = pl.pallas_call(
        kernel,
        out_shape=tuple(out_shapes),
        grid=(n_steps,),
        in_specs=in_specs,
        out_specs=tuple(out_specs),
        compiler_params=pltpu.CompilerParams(
            dimension_semantics=("parallel",)),
        cost_estimate=cost,
    )(*inputs)

    out = results[0].reshape(bs, H, Q, Dv)
    attn = results[1].reshape(bs, H, Q, S)
    if return_scores:
        scores = results[2].reshape(bs, H, Q, S)
        return out, attn, scores
    return out, attn


def _reference(q, k, v, scale, prev=None, key_padding_mask=None, attn_mask=None):
    scores = jnp.einsum("bhqd,bhds->bhqs", q, k).astype(jnp.float32) * scale
    if prev is not None:
        scores = scores + prev
    if attn_mask is not None:
        if jnp.issubdtype(attn_mask.dtype, jnp.bool_):
            scores = jnp.where(attn_mask[None, ...], -jnp.inf, scores)
        else:
            scores = scores + attn_mask[None, ...]
    if key_padding_mask is not None:
        scores = jnp.where(key_padding_mask[:, None, None, :], -jnp.inf, scores)
    attn = jax.nn.softmax(scores, axis=-1)
    out = jnp.einsum("bhqs,bhsd->bhqd", attn.astype(v.dtype), v)
    return out, attn, scores


if __name__ == "__main__":
    # Module config: d_model=32, n_heads=4 -> head_dim=8; lsa=False -> static scale.
    bs, n_heads, q_len, seq_len = 2, 4, 8, 8
    d_model = 32
    head_dim = d_model // n_heads
    d_k = d_v = head_dim
    scale = float(head_dim ** (-0.5))

    key = jax.random.PRNGKey(0)
    kq, kk, kv, kp = jax.random.split(key, 4)
    q = jax.random.normal(kq, (bs, n_heads, q_len, d_k), dtype=jnp.float32)
    k = jax.random.normal(kk, (bs, n_heads, d_k, seq_len), dtype=jnp.float32)
    v = jax.random.normal(kv, (bs, n_heads, seq_len, d_v), dtype=jnp.float32)
    prev = 0.1 * jax.random.normal(kp, (bs, n_heads, q_len, seq_len),
                                   dtype=jnp.float32)

    attn_mask = jnp.triu(jnp.ones((q_len, seq_len), dtype=bool), k=1)[None, ...]
    key_padding_mask = jnp.zeros((bs, seq_len), dtype=bool).at[:, -1].set(True)

    # --- 1) residual-attention path, f32 matmuls (tight check) --------------
    out, attn, scores = scaled_dot_product_attention(
        q, k, v, scale, prev=prev,
        key_padding_mask=key_padding_mask, attn_mask=attn_mask,
        res_attention=True)
    jax.block_until_ready(out)
    jax.block_until_ready(attn)
    jax.block_until_ready(scores)

    ref_out, ref_attn, ref_scores = _reference(
        q, k, v, scale, prev, key_padding_mask, attn_mask)
    assert jnp.allclose(out, ref_out, atol=1e-5, rtol=1e-5)
    assert jnp.allclose(attn, ref_attn, atol=1e-5, rtol=1e-5)
    finite = jnp.isfinite(ref_scores)
    assert jnp.array_equal(jnp.isfinite(scores), finite)
    assert jnp.allclose(jnp.where(finite, scores, 0.0),
                        jnp.where(finite, ref_scores, 0.0), atol=1e-5, rtol=1e-5)

    # --- 2) plain path: no prev / no masks / no scores writeback ------------
    out2, attn2 = scaled_dot_product_attention(q, k, v, scale)
    jax.block_until_ready(out2)
    ref_out2, ref_attn2, _ = _reference(q, k, v, scale)
    assert jnp.allclose(out2, ref_out2, atol=1e-5, rtol=1e-5)
    assert jnp.allclose(attn2, ref_attn2, atol=1e-5, rtol=1e-5)

    # --- 3) bf16 MXU operands (v6e/v7x fast path), loose check ---------------
    out3, attn3, scores3 = scaled_dot_product_attention(
        q, k, v, scale, prev=prev,
        key_padding_mask=key_padding_mask, attn_mask=attn_mask,
        res_attention=True, matmul_dtype=jnp.bfloat16)
    jax.block_until_ready(out3)
    assert jnp.allclose(out3, ref_out, atol=1e-1, rtol=1e-1)
    assert jnp.allclose(attn3, ref_attn, atol=1e-1, rtol=1e-1)

    print("KERNEL_OK")
</pallas_src>

<mosaic_0001>
module attributes {stable_mosaic.version = 11 : i64} {
  func.func @_sdpa_kernel(%arg0: i32, %arg1: memref<4x8x8xf32, #tpu.memory_space<vmem>>, %arg2: memref<4x8x8xf32, #tpu.memory_space<vmem>>, %arg3: memref<4x8x8xf32, #tpu.memory_space<vmem>>, %arg4: memref<4x8x8xf32, #tpu.memory_space<vmem>>, %arg5: memref<1x8x8xi8, #tpu.memory_space<vmem>>, %arg6: memref<4x1x8xi8, #tpu.memory_space<vmem>>, %arg7: memref<4x8x8xf32, #tpu.memory_space<vmem>>, %arg8: memref<4x8x8xf32, #tpu.memory_space<vmem>>, %arg9: memref<4x8x8xf32, #tpu.memory_space<vmem>>) attributes {dimension_semantics = [#tpu.dimension_semantics<parallel>], iteration_bounds = array<i64: 2>, scalar_prefetch = 0 : i64, scratch_operands = 0 : i64, tpu.core_type = #tpu.core_type<tc>, window_params = [{transform_indices = @transform_0, window_bounds = array<i64: 4, 8, 8>}, {transform_indices = @transform_1, window_bounds = array<i64: 4, 8, 8>}, {transform_indices = @transform_2, window_bounds = array<i64: 4, 8, 8>}, {transform_indices = @transform_3, window_bounds = array<i64: 4, 8, 8>}, {pipeline_mode = #tpu.pipeline_mode<synchronous>, transform_indices = @transform_4, window_bounds = array<i64: 1, 8, 8>}, {transform_indices = @transform_5, window_bounds = array<i64: 4, 1, 8>}, {transform_indices = @transform_6, window_bounds = array<i64: 4, 8, 8>}, {transform_indices = @transform_7, window_bounds = array<i64: 4, 8, 8>}, {transform_indices = @transform_8, window_bounds = array<i64: 4, 8, 8>}]} {
    %c0 = arith.constant 0 : index
    %c0_0 = arith.constant 0 : index
    %c0_1 = arith.constant 0 : index
    %0 = vector.load %arg1[%c0, %c0_0, %c0_1] : memref<4x8x8xf32, #tpu.memory_space<vmem>>, vector<4x8x8xf32>
    %c0_2 = arith.constant 0 : index
    %c0_3 = arith.constant 0 : index
    %c0_4 = arith.constant 0 : index
    %1 = vector.load %arg2[%c0_2, %c0_3, %c0_4] : memref<4x8x8xf32, #tpu.memory_space<vmem>>, vector<4x8x8xf32>
    %c0_5 = arith.constant 0 : index
    %c0_6 = arith.constant 0 : index
    %c0_7 = arith.constant 0 : index
    %2 = vector.load %arg3[%c0_5, %c0_6, %c0_7] : memref<4x8x8xf32, #tpu.memory_space<vmem>>, vector<4x8x8xf32>
    "tpu.trace_start"() <{level = 10 : i32, message = "bqd,bds->bqs"}> : () -> ()
    %cst = arith.constant dense<0.000000e+00> : vector<4x8x8xf32>
    %3 = tpu.matmul %0, %1, %cst {dimension_numbers = #tpu.dot_dimension_numbers<[2], [1], [1], [2], [0, 0, 0, 1, 1, 2], [0], [0]>} : vector<4x8x8xf32>, vector<4x8x8xf32>, vector<4x8x8xf32> -> vector<4x8x8xf32>
    "tpu.trace_stop"() : () -> ()
    %cst_8 = arith.constant 0.353553385 : f32
    %4 = vector.broadcast %cst_8 : f32 to vector<4x8x8xf32>
    %5 = arith.mulf %3, %4 : vector<4x8x8xf32>
    %c0_9 = arith.constant 0 : index
    %c0_10 = arith.constant 0 : index
    %c0_11 = arith.constant 0 : index
    %6 = vector.load %arg4[%c0_9, %c0_10, %c0_11] : memref<4x8x8xf32, #tpu.memory_space<vmem>>, vector<4x8x8xf32>
    %7 = arith.addf %5, %6 : vector<4x8x8xf32>
    %c0_12 = arith.constant 0 : index
    %c0_13 = arith.constant 0 : index
    %c0_14 = arith.constant 0 : index
    %8 = vector.load %arg5[%c0_12, %c0_13, %c0_14] : memref<1x8x8xi8, #tpu.memory_space<vmem>>, vector<1x8x8xi8>
    %c0_i8 = arith.constant 0 : i8
    %9 = vector.broadcast %c0_i8 : i8 to vector<1x8x8xi8>
    %10 = arith.cmpi ne, %8, %9 : vector<1x8x8xi8>
    %c0_15 = arith.constant 0 : index
    %c0_16 = arith.constant 0 : index
    %c0_17 = arith.constant 0 : index
    %11 = vector.load %arg6[%c0_15, %c0_16, %c0_17] : memref<4x1x8xi8, #tpu.memory_space<vmem>>, vector<4x1x8xi8>
    %c0_i8_18 = arith.constant 0 : i8
    %12 = vector.broadcast %c0_i8_18 : i8 to vector<4x1x8xi8>
    %13 = arith.cmpi ne, %11, %12 : vector<4x1x8xi8>
    %14 = vector.broadcast %10 : vector<1x8x8xi1> to vector<4x8x8xi1>
    %15 = vector.broadcast %13 : vector<4x1x8xi1> to vector<4x8x8xi1>
    %16 = arith.ori %14, %15 : vector<4x8x8xi1>
    %cst_19 = arith.constant 0xFF800000 : f32
    %17 = vector.broadcast %cst_19 : f32 to vector<4x8x8xf32>
    %18 = arith.select %16, %17, %7 : vector<4x8x8xi1>, vector<4x8x8xf32>
    %c0_20 = arith.constant 0 : index
    %c0_21 = arith.constant 0 : index
    %c0_22 = arith.constant 0 : index
    %19 = vector.load %arg9[%c0_20, %c0_21, %c0_22] : memref<4x8x8xf32, #tpu.memory_space<vmem>>, vector<4x8x8xf32>
    tpu.vector_store %arg9[%c0_20, %c0_21, %c0_22], %18 {strides = array<i32>} : memref<4x8x8xf32, #tpu.memory_space<vmem>>, vector<4x8x8xf32>,
    %cst_23 = arith.constant dense<0xFF800000> : vector<4x8xf32>
    %20 = vector.multi_reduction <maximumf>, %18, %cst_23 [2] : vector<4x8x8xf32> to vector<4x8xf32>
    %21 = vector.shape_cast %20 : vector<4x8xf32> to vector<4x8x1xf32>
    %22 = vector.broadcast %21 : vector<4x8x1xf32> to vector<4x8x8xf32>
    %23 = arith.subf %18, %22 : vector<4x8x8xf32>
    %24 = math.exp %23 : vector<4x8x8xf32>
    %cst_24 = arith.constant dense<0.000000e+00> : vector<4x8xf32>
    %25 = vector.multi_reduction <add>, %24, %cst_24 [2] : vector<4x8x8xf32> to vector<4x8xf32>
    %26 = vector.shape_cast %25 : vector<4x8xf32> to vector<4x8x1xf32>
    %27 = tpu.reciprocal %26 : vector<4x8x1xf32> -> vector<4x8x1xf32>
    %28 = vector.broadcast %27 : vector<4x8x1xf32> to vector<4x8x8xf32>
    %29 = arith.mulf %24, %28 : vector<4x8x8xf32>
    %c0_25 = arith.constant 0 : index
    %c0_26 = arith.constant 0 : index
    %c0_27 = arith.constant 0 : index
    %30 = vector.load %arg8[%c0_25, %c0_26, %c0_27] : memref<4x8x8xf32, #tpu.memory_space<vmem>>, vector<4x8x8xf32>
    tpu.vector_store %arg8[%c0_25, %c0_26, %c0_27], %29 {strides = array<i32>} : memref<4x8x8xf32, #tpu.memory_space<vmem>>, vector<4x8x8xf32>,
    "tpu.trace_start"() <{level = 10 : i32, message = "bqs,bsd->bqd"}> : () -> ()
    %cst_28 = arith.constant dense<0.000000e+00> : vector<4x8x8xf32>
    %31 = tpu.matmul %29, %2, %cst_28 {dimension_numbers = #tpu.dot_dimension_numbers<[2], [1], [1], [2], [0, 0, 0, 1, 1, 2], [0], [0]>} : vector<4x8x8xf32>, vector<4x8x8xf32>, vector<4x8x8xf32> -> vector<4x8x8xf32>
    "tpu.trace_stop"() : () -> ()
    %c0_29 = arith.constant 0 : index
    %c0_30 = arith.constant 0 : index
    %c0_31 = arith.constant 0 : index
    %32 = vector.load %arg7[%c0_29, %c0_30, %c0_31] : memref<4x8x8xf32, #tpu.memory_space<vmem>>, vector<4x8x8xf32>
    tpu.vector_store %arg7[%c0_29, %c0_30, %c0_31], %31 {strides = array<i32>} : memref<4x8x8xf32, #tpu.memory_space<vmem>>, vector<4x8x8xf32>,
    return
  }
  func.func @transform_0(%arg0: i32) -> (i32, i32, i32) {
    %c0_i32 = arith.constant 0 : i32
    %c0_i32_0 = arith.constant 0 : i32
    %c0_i32_1 = arith.constant 0 : i32
    return %arg0, %c0_i32, %c0_i32_0 : i32, i32, i32
  }
  func.func @transform_1(%arg0: i32) -> (i32, i32, i32) {
    %c0_i32 = arith.constant 0 : i32
    %c0_i32_0 = arith.constant 0 : i32
    %c0_i32_1 = arith.constant 0 : i32
    return %arg0, %c0_i32, %c0_i32_0 : i32, i32, i32
  }
  func.func @transform_2(%arg0: i32) -> (i32, i32, i32) {
    %c0_i32 = arith.constant 0 : i32
    %c0_i32_0 = arith.constant 0 : i32
    %c0_i32_1 = arith.constant 0 : i32
    return %arg0, %c0_i32, %c0_i32_0 : i32, i32, i32
  }
  func.func @transform_3(%arg0: i32) -> (i32, i32, i32) {
    %c0_i32 = arith.constant 0 : i32
    %c0_i32_0 = arith.constant 0 : i32
    %c0_i32_1 = arith.constant 0 : i32
    return %arg0, %c0_i32, %c0_i32_0 : i32, i32, i32
  }
  func.func @transform_4(%arg0: i32) -> (i32, i32, i32) {
    %c0_i32 = arith.constant 0 : i32
    %c0_i32_0 = arith.constant 0 : i32
    %c0_i32_1 = arith.constant 0 : i32
    %c0_i32_2 = arith.constant 0 : i32
    return %c0_i32, %c0_i32_0, %c0_i32_1 : i32, i32, i32
  }
  func.func @transform_5(%arg0: i32) -> (i32, i32, i32) {
    %c0_i32 = arith.constant 0 : i32
    %c0_i32_0 = arith.constant 0 : i32
    %c0_i32_1 = arith.constant 0 : i32
    return %arg0, %c0_i32, %c0_i32_0 : i32, i32, i32
  }
  func.func @transform_6(%arg0: i32) -> (i32, i32, i32) {
    %c0_i32 = arith.constant 0 : i32
    %c0_i32_0 = arith.constant 0 : i32
    %c0_i32_1 = arith.constant 0 : i32
    return %arg0, %c0_i32, %c0_i32_0 : i32, i32, i32
  }
  func.func @transform_7(%arg0: i32) -> (i32, i32, i32) {
    %c0_i32 = arith.constant 0 : i32
    %c0_i32_0 = arith.constant 0 : i32
    %c0_i32_1 = arith.constant 0 : i32
    return %arg0, %c0_i32, %c0_i32_0 : i32, i32, i32
  }
  func.func @transform_8(%arg0: i32) -> (i32, i32, i32) {
    %c0_i32 = arith.constant 0 : i32
    %c0_i32_0 = arith.constant 0 : i32
    %c0_i32_1 = arith.constant 0 : i32
    return %arg0, %c0_i32, %c0_i32_0 : i32, i32, i32
  }
}

</mosaic_0001>

<bundles_post_ra>
// kernel: tpu_custom_call.1
= control target key start
LH: loop header
LB: loop body
LE: loop exit
PB: predicated region body
PF: predicated region fallthrough
CT: control target
= control target key end

     0   :  { %s2502_s0 = inlined_call_operand.hbm [shape: f32[8,8,8], index: 0, kind: input, shape index: {}]   ;;  %s2503_s1 = inlined_call_operand.hbm [shape: f32[8,8,8], index: 1, kind: input, shape index: {}]   ;;  %s2504_s2 = inlined_call_operand.hbm [shape: f32[8,8,8], index: 2, kind: input, shape index: {}]   ;;  %s2505_s3 = inlined_call_operand.hbm [shape: f32[8,8,8], index: 3, kind: input, shape index: {}]   ;;  %s2506_s4 = inlined_call_operand.vmem [shape: s8[1,8,8], index: 4, kind: input, shape index: {}]   ;;  %s2507_s5 = inlined_call_operand.vmem [shape: s8[8,1,8], index: 5, kind: input, shape index: {}]   ;;  %s2508_s6 = inlined_call_operand.hbm [shape: f32[8,8,8], index: 6, kind: output, shape index: {0}]   ;;  %s2509_s7 = inlined_call_operand.hbm [shape: f32[8,8,8], index: 7, kind: output, shape index: {1}]   ;;  %s2510_s8 = inlined_call_operand.hbm [shape: f32[8,8,8], index: 8, kind: output, shape index: {2}]  }
   0x1   :  { %2524 = sst [smem:[#allocation24_spill]] %s2502_s0 }
   0x2   :  { %2525 = sst [smem:[#allocation25_spill]] %s2503_s1 }
   0x3   :  { %14 = vsyncpa [#allocation3], 0 }
   0x4   :  { %16 = vsyncpa [#allocation3 + $0x1], 0 }
   0x5   :  { %17 = vsyncpa [#allocation6], 0 }
   0x6   :  { %19 = vsyncpa [#allocation6 + $0x1], 0 }
   0x7   :  { %20 = vsyncpa [#allocation9], 0 }
   0x8   :  { %22 = vsyncpa [#allocation9 + $0x1], 0 }
   0x9   :  { %23 = vsyncpa [#allocation4], 0 }
   0xa   :  { %25 = vsyncpa [#allocation4 + $0x1], 0 }
   0xb   :  { %26 = vsyncpa [#allocation12], 0 }
   0xc   :  { %28 = vsyncpa [#allocation12 + $0x1], 0  ;;  %s1991_s27 = smov 0   ;;  %s1993_s28 = smov 0  }
   0xd   :  { %s1995_s29 = smov 0   ;;  %s1997_s30 = smov 0  }
   0xe LB: > { %2526 = sst [smem:[#allocation19_spill]] %s1926_s29  ;;  %s2012_s9 = sadd.s32 4294967295, %s1930_s30   ;;  %s1930_s30 = sphi %s1997_s30, %s2560_s30   ;;  %s1926_s29 = sphi %s1995_s29, %s2562_s29   ;;  %s1922_s28 = sphi %s1993_s28, %s2564_s28   ;;  %s1918_s27 = sphi %s1991_s27, %s2563_s27  }
   0xf   : > { %2527 = sst [smem:[#allocation20_spill]] %s1930_s30  ;;  %s2511_s10 = sadd.s32 4294967294, %s1930_s30  }
  0x10   : > { %s2016_s11 = sadd.s32 1, %s1930_s30   ;;  %s41_s12 = sadd.s32 1, %s1926_s29 }
  0x11   : > { %2528 = sst [smem:[#allocation21_spill]] %s2016_s11  ;;  %s38_s13 = ssub.s32 %s1930_s30, %s2016_s11 }
  0x12   : > { %p48_p0 = scmp.ne.s32.totalorder %s1926_s29, %s1922_s28  ;;  %p39_p1 = scmp.eq.s32.totalorder %s38_s13, 0 }
  0x13   : > { %p49_p2 = scmp.eq.s32.totalorder %s1930_s30, 0  ;;  %p54_p3 = scmp.ne.s32.totalorder %s1922_s28, %s1918_s27 }
  0x14   : > { %p55_p4 = scmp.eq.s32.totalorder %s2012_s9, 0  ;;  %p203_p7 = scmp.eq.s32.totalorder %s2012_s9, 1 }
  0x15   : > { %s2028_s14 = scalar_select %p39_p1, %s1926_s29, %s41_s12  }
  0x16   : > { %p50_p5 = por %p49_p2, %p48_p0  ;;  %p2030_p6 = por %p55_p4, %p54_p3 }
  0x17   : > { %2529 = sst [smem:[#allocation22_spill]] %s2028_s14  ;;  %p209_p8 = scmp.eq.s32.totalorder %s2511_s10, 1 }
  0x18   : > { %s2530_s15 = scalar_select %p2030_p6, 1, 0 }
  0x19   : > { %p1619_p10 = scmp.lt.s32.totalorder %s1930_s30, 2  ;;  %p2039_p11 = por %p203_p7, %p48_p0 }
  0x1a   : > { %p2043_p12 = por %p209_p8, %p54_p3  ;;  %s2048_s18 = sand.u32 1, %s1926_s29  }
  0x1b   : > { %s2531_s16 = scalar_select %p2039_p11, 1, 0 }
  0x1c   : > { %s2532_s17 = scalar_select %p2043_p12, 1, 0 }
  0x1d   : > { %s2051_s19 = sshll.u32 %s1930_s30, 9  ;;  %s2054_s20 = sshll.u32 %s2048_s18, 5 }
  0x1e   : > { %2533 = sst [smem:[#allocation23_spill]] %s2532_s17  ;;  %p2056_p13 = pnand %p1619_p10, %p50_p5 }
  0x1f   : > { %s305_s22 = sand.u32 1, %s1930_s30   ;;  %s2535_s1 = sld [smem:[#allocation25_spill]] }
  0x20   : > { %s309_s26 = scalar_lea.vmem [#allocation5], %s2054_s20  ;;  %s2071_s13 = scalar_lea.sflag [#allocation6], %s305_s22 }
  0x21   : > { %s316_s12 = sshll.u32 %s309_s26, 4  ;;  %p2077_p2 = pneg %p2056_p13  ;;  %s2068_s12 = int_to_ptr.vmem [resolvable:$true] %s316_s12 }
  0x25   : > { %s2065_s25 = scalar_lea.hbm %s2535_s1, %s2051_s19  ;;  %s1681_s26 = scalar_lea.hbm %s2535_s1, 1024 }
  0x26   : > { %s1676_s10 = scalar_lea.hbm %s2065_s25, 512  ;;  %p1682_p5 = scmp.lt.u32.totalorder %s2065_s25, %s2535_s1 }
  0x27   : > { %p1677_p1 = scmp.ne.s32.totalorder %s2065_s25, %s1676_s10  ;;  %p1683_p7 = scmp.lt.u32.totalorder %s1681_s26, %s1676_s10 }
  0x28   : > { %p1685_p10 = scmp.lt.u32.totalorder %s1676_s10, %s2065_s25 }
  0x29   : > { %p1679_p3 = pnand %p2077_p2, %p1677_p1  ;;  %p1684_p8 = por %p1683_p7, %p1682_p5 }
  0x2b   : > { %p1680_p4 = pneg %p1679_p3  ;;  %p1686_p9 = por %p1685_p10, %p1684_p8 }
  0x2d   : > { %p1687_p0 = pnand %p1686_p9, %p1680_p4 }
  0x2f   : > { %1690 = shalt.err (!%p1687_p0)
}
  0x30   : > { %s1691_s22 = scalar_lea.vmem %s2068_s12, 512  ;;  %s1932_s23 = smov [#allocation5]  }
  0x31   : > { %p1692_p1 = scmp.ne.s32.totalorder %s2068_s12, %s1691_s22  ;;  %s1696_s24 = sshll.u32 %s1932_s23, 4  ;;  %s1697_s24 = int_to_ptr.vmem [resolvable:$false] %s1696_s24 }
  0x32   : > { %s1698_s29 = scalar_lea.vmem %s1697_s24, 1024  ;;  %p1699_p11 = scmp.lt.s32.totalorder %s2068_s12, %s1697_s24 }
  0x33   : > { %p1694_p3 = pnand %p1692_p1, %p2077_p2  ;;  %p1700_p6 = scmp.lt.s32.totalorder %s1698_s29, %s1691_s22 }
  0x35   : > { %p1695_p12 = pneg %p1694_p3  ;;  %p1701_p5 = por %p1700_p6, %p1699_p11 }
  0x37   : > { %p1702_p7 = pnand %p1701_p5, %p1695_p12 }
  0x39   : > { %1705 = shalt.err (!%p1702_p7)
}
  0x3a   : > { %s2517_s10 = smov 128   ;;  %s2519_s11 = smov 8  }
  0x3b   : > { %1602 = dma.hbm_to_vmem [thread:$0]  (!%p2056_p13), %s2065_s25, 512, %s2068_s12, %s2071_s13, %s2517_s10, %s2517_s10, %s2519_s11  }
  0x3c   : > { %p374_p6 = scmp.lt.s32.totalorder %s1930_s30, 3  ;;  %s2537_s0 = sld [smem:[#allocation24_spill]] }
  0x3d   : > { %p2538_p9 = scmp.ge.s32.totalorder %s1930_s30, 1  ;;  %s288_s29 = scalar_lea.vmem [#allocation2], %s2054_s20 }
  0x3e   : > { %s295_s1 = sshll.u32 %s288_s29, 4  ;;  %s285_s25 = scalar_lea.sflag [#allocation3], %s2048_s18  ;;  %s2118_s1 = int_to_ptr.vmem [resolvable:$true] %s295_s1 }
  0x3f   : > { %p2113_p11 = pnand %p2538_p9, %p374_p6 }
  0x41   : > { %s2539_s24 = scalar_select %p2113_p11, 1, 0 }
  0x42   : > { %s2109_s23 = scalar_lea.hbm %s2537_s0, %s2051_s19  ;;  %s1711_s10 = scalar_lea.hbm %s2537_s0, 1024 }
  0x43   : > { %s1706_s12 = scalar_lea.hbm %s2109_s23, 512  ;;  %p1712_p8 = scmp.lt.u32.totalorder %s2109_s23, %s2537_s0 }
  0x44   : > { %p1707_p12 = scmp.ne.s32.totalorder %s2109_s23, %s1706_s12  ;;  %p1713_p10 = scmp.lt.u32.totalorder %s1711_s10, %s1706_s12 }
  0x45   : > { %p1715_p3 = scmp.lt.u32.totalorder %s1706_s12, %s2109_s23 }
  0x46   : > { %p1709_p0 = pnand %p1707_p12, %p2077_p2  ;;  %p1714_p1 = por %p1713_p10, %p1712_p8 }
  0x48   : > { %p1710_p4 = pneg %p1709_p0  ;;  %p1716_p5 = por %p1715_p3, %p1714_p1 }
  0x4a   : > { %p1717_p7 = pnand %p1716_p5, %p1710_p4 }
  0x4c   : > { %1720 = shalt.err (!%p1717_p7)
}
  0x4d   : > { %s1721_s29 = scalar_lea.vmem %s2118_s1, 512  ;;  %s1935_s26 = smov [#allocation2]  }
  0x4e   : > { %p1722_p6 = scmp.ne.s32.totalorder %s2118_s1, %s1721_s29  ;;  %s1726_s22 = sshll.u32 %s1935_s26, 4  ;;  %s1727_s22 = int_to_ptr.vmem [resolvable:$false] %s1726_s22 }
  0x4f   : > { %s1728_s30 = scalar_lea.vmem %s1727_s22, 1024  ;;  %p1729_p0 = scmp.lt.s32.totalorder %s2118_s1, %s1727_s22 }
  0x50   : > { %p1724_p9 = pnand %p1722_p6, %p2077_p2  ;;  %p1730_p11 = scmp.lt.s32.totalorder %s1728_s30, %s1721_s29 }
  0x52   : > { %p1725_p12 = pneg %p1724_p9  ;;  %p1731_p8 = por %p1730_p11, %p1729_p0 }
  0x54   : > { %p1732_p10 = pnand %p1731_p8, %p1725_p12 }
  0x56   : > { %1735 = shalt.err (!%p1732_p10)
}
  0x57   : > { %s2540_s10 = smov 8   ;;  %s2541_s11 = smov 128  }
  0x58   : > { %1599 = dma.hbm_to_vmem [thread:$0]  (!%p2056_p13), %s2109_s23, 512, %s2118_s1, %s285_s25, %s2541_s11, %s2541_s11, %s2540_s10  }
  0x59   : > { %s2151_s29 = scalar_lea.hbm %s2504_s2, %s2051_s19  ;;  %s330_s22 = scalar_lea.vmem [#allocation7], %s2054_s20 }
  0x5a   : > { %s337_s30 = sshll.u32 %s330_s22, 4  ;;  %s1736_s0 = scalar_lea.hbm %s2151_s29, 512  ;;  %s2154_s30 = int_to_ptr.vmem [resolvable:$true] %s337_s30 }
  0x5b   : > { %p1737_p11 = scmp.ne.s32.totalorder %s2151_s29, %s1736_s0  ;;  %s1741_s23 = scalar_lea.hbm %s2504_s2, 1024 }
  0x5c   : > { %p1742_p3 = scmp.lt.u32.totalorder %s2151_s29, %s2504_s2  ;;  %p1743_p5 = scmp.lt.u32.totalorder %s1741_s23, %s1736_s0 }
  0x5d   : > { %p1739_p4 = pnand %p1737_p11, %p2077_p2  ;;  %p1745_p6 = scmp.lt.u32.totalorder %s1736_s0, %s2151_s29 }
  0x5e   : > { %p1744_p7 = por %p1743_p5, %p1742_p3 }
  0x5f   : > { %p1740_p1 = pneg %p1739_p4 }
  0x60   : > { %p1746_p9 = por %p1745_p6, %p1744_p7 }
  0x62   : > { %p1747_p12 = pnand %p1746_p9, %p1740_p1 }
  0x64   : > { %1750 = shalt.err (!%p1747_p12)
}
  0x65   : > { %s1751_s26 = scalar_lea.vmem %s2154_s30, 512  ;;  %s1936_s17 = smov [#allocation7]  }
  0x66   : > { %p1752_p0 = scmp.ne.s32.totalorder %s2154_s30, %s1751_s26  ;;  %s1756_s22 = sshll.u32 %s1936_s17, 4  ;;  %s1757_s22 = int_to_ptr.vmem [resolvable:$false] %s1756_s22 }
  0x67   : > { %s1758_s1 = scalar_lea.vmem %s1757_s22, 1024  ;;  %p1759_p11 = scmp.lt.s32.totalorder %s2154_s30, %s1757_s22 }
  0x68   : > { %p1754_p8 = pnand %p1752_p0, %p2077_p2  ;;  %p1760_p4 = scmp.lt.s32.totalorder %s1758_s1, %s1751_s26 }
  0x6a   : > { %p1755_p10 = pneg %p1754_p8  ;;  %p1761_p3 = por %p1760_p4, %p1759_p11 }
  0x6c   : > { %p1762_p5 = pnand %p1761_p3, %p1755_p10 }
  0x6e   : > { %1765 = shalt.err (!%p1762_p5)
}
  0x6f   : > { %1605 = dma.hbm_to_vmem [thread:$0]  (!%p2056_p13), %s2151_s29, 512, %s2154_s30, %s2071_s13, %s2541_s11, %s2541_s11, %s2540_s10  }
  0x70   : > { %s2185_s25 = scalar_lea.hbm %s2505_s3, %s2051_s19  ;;  %s351_s12 = scalar_lea.vmem [#allocation8], %s2054_s20 }
  0x71   : > { %s358_s26 = sshll.u32 %s351_s12, 4  ;;  %s348_s17 = scalar_lea.sflag [#allocation9], %s2048_s18  ;;  %s2188_s26 = int_to_ptr.vmem [resolvable:$true] %s358_s26 }
  0x72   : > { %s1766_s22 = scalar_lea.hbm %s2185_s25, 512  ;;  %s1771_s30 = scalar_lea.hbm %s2505_s3, 1024 }
  0x73   : > { %p1767_p1 = scmp.ne.s32.totalorder %s2185_s25, %s1766_s22  ;;  %p1772_p9 = scmp.lt.u32.totalorder %s2185_s25, %s2505_s3 }
  0x74   : > { %p1773_p12 = scmp.lt.u32.totalorder %s1771_s30, %s1766_s22  ;;  %p1775_p8 = scmp.lt.u32.totalorder %s1766_s22, %s2185_s25 }
  0x75   : > { %p1769_p7 = pnand %p1767_p1, %p2077_p2 }
  0x76   : > { %p1774_p0 = por %p1773_p12, %p1772_p9 }
  0x77   : > { %p1770_p6 = pneg %p1769_p7 }
  0x78   : > { %p1776_p10 = por %p1775_p8, %p1774_p0 }
  0x7a   : > { %p1777_p11 = pnand %p1776_p10, %p1770_p6 }
  0x7c   : > { %1780 = shalt.err (!%p1777_p11)
}
  0x7d   : > { %s1781_s20 = scalar_lea.vmem %s2188_s26, 512  ;;  %s1937_s0 = smov [#allocation8]  }
  0x7e   : > { %p1782_p4 = scmp.ne.s32.totalorder %s2188_s26, %s1781_s20  ;;  %s1786_s23 = sshll.u32 %s1937_s0, 4  ;;  %s1787_s23 = int_to_ptr.vmem [resolvable:$false] %s1786_s23 }
  0x7f   : > { %s1788_s12 = scalar_lea.vmem %s1787_s23, 1024  ;;  %p1789_p1 = scmp.lt.s32.totalorder %s2188_s26, %s1787_s23 }
  0x80   : > { %p1784_p3 = pnand %p1782_p4, %p2077_p2  ;;  %p1790_p7 = scmp.lt.s32.totalorder %s1788_s12, %s1781_s20 }
  0x82   : > { %p1785_p5 = pneg %p1784_p3  ;;  %p1791_p9 = por %p1790_p7, %p1789_p1 }
  0x84   : > { %p1792_p12 = pnand %p1791_p9, %p1785_p5 }
  0x86   : > { %1795 = shalt.err (!%p1792_p12)
}
  0x87   : > { %1608 = dma.hbm_to_vmem [thread:$0]  (!%p2056_p13), %s2185_s25, 512, %s2188_s26, %s348_s17, %s2541_s11, %s2541_s11, %s2540_s10  }
  0x88   : > { %p2542_p2 = scmp.ne.s32.totalorder %s2539_s24, 0 }
  0x89   : > { %s2220_s14 = sand.u32 (!%p2542_p2), 1, %s1922_s28   ;;  %p2543_p6 = scmp.ne.s32.totalorder (!%p2542_p2), %s2530_s15, 0 }
  0x8a   : > { %378 = sbr.rel (%p2542_p2) target bundleno = 921 (0x399), region = 44  ;;  %s2223_s22 = sshll.u32 (!%p2542_p2), %s2220_s14, 5 }
  0x8b   : > { %s381_s21 = scalar_lea.sflag (!%p2542_p2), [#allocation3], %s2220_s14  ;;  %s2227_s13 = scalar_lea.vmem (!%p2542_p2), [#allocation2], %s2223_s22 }
  0x91   : > { %1897 = dma.done.wait (%p2543_p6), %s381_s21, 512  }
  0x92   : > { %1899 = vsyncadd (%p2543_p6), %s381_s21, 4294966784  ;;  %s389_s18 = sand.u32 1, %s2012_s9   ;;  %s393_s10 = scalar_lea.vmem [#allocation5], %s2223_s22 }
  0x93   : > { %s390_s24 = scalar_lea.sflag [#allocation6], %s389_s18 }
  0x94   : > { %1901 = dma.done.wait (%p2543_p6), %s390_s24, 1024  }
  0x95   : > { %1903 = vsyncadd (%p2543_p6), %s390_s24, 4294966272  ;;  %s2242_s11 = scalar_lea.vmem [#allocation7], %s2223_s22  ;;  %s408_s25 = scalar_lea.sflag [#allocation9], %s2220_s14 }
  0x96   : > { %s2246_s26 = scalar_lea.vmem [#allocation8], %s2223_s22 }
  0x97   : > { %1905 = dma.done.wait (%p2543_p6), %s408_s25, 512  }
  0x98   : > { %1907 = vsyncadd (%p2543_p6), %s408_s25, 4294966784  ;;  %v1938_v0 = vmov 0.0   ;;  %vm1939_vm0 = vmmov 0   ;;  %vm499_vm1 = vcmask 64512   ;;  %v491_v1 = vld [vmem:[%s393_s10] sm:$0xff]  ;;  %v493_v3 = vld [vmem:[%s393_s10 + $0x10] sm:$0xff]  ;;  %v835_v15 = vlaneseq }
  0x99   : > { %1542 = vmatprep.subr.mxu0 %v1938_v0  ;;  %1544 = vmatprep.mubr.msk.f32.mxu0 %vm1939_vm0, %v1938_v0  ;;  %v487_v2 = vld [vmem:[%s2227_s13] sm:$0xff]  ;;  %v492_v4 = vld [vmem:[%s393_s10 + $0x8] sm:$0xff]  ;;  %v489_v6 = vld [vmem:[%s2227_s13 + $0x10] sm:$0xff]  ;;  %s1499_s15 = sshll.u32 %s2012_s9, 2  ;;  %v1940_v12 = vmov 0   ;;  %s2318_s20 = scalar_lea.vmem [#allocation13], %s2223_s22 }
  0x9a   : > { %1547 = vmatprep.subr.mxu1 %v1938_v0  ;;  %1549 = vmatprep.mubr.msk.f32.mxu1 %vm1939_vm0, %v1938_v0  ;;  %v488_v5 = vld [vmem:[%s2227_s13 + $0x8] sm:$0xff]  ;;  %v494_v7 = vld [vmem:[%s393_s10 + $0x18] sm:$0xff]  ;;  %p478_p13 = scmp.lt.s32.totalorder %s1499_s15, 7  ;;  %v804_v18 = vld [vmem:[%s2506_s4] sm:$0x3]  ;;  %v836_v20 = vshrl.u32 %v835_v15, 7 }
  0x9b   : > { %1543 = vmatpush3.msra.mxu0 %v491_v1  ;;  %1548 = vmatpush3.msra.mxu1 %v492_v4  ;;  %v490_v8 = vld [vmem:[%s2227_s13 + $0x18] sm:$0xff]  ;;  %vm805_vm6 = vnez %v804_v18  ;;  %v796_v38 = vld [vmem:[%s2246_s26] sm:$0xff]  ;;  %v797_v44 = vld [vmem:[%s2246_s26 + $0x8] sm:$0xff]  ;;  %s465_s0 = scalar_lea.vmem [#allocation11], %s2223_s22  ;;  %s1267_s23 = sshll.u32 %s2318_s20, 4  ;;  %s2369_s23 = int_to_ptr.vmem [resolvable:$true] %s1267_s23 }
  0x9c   : > { %1545 = vmatmul.mubr.msk.f32.vlgmr.msra.gmra.mrb[0].mxu0 %vm499_vm1, %v487_v2  ;;  %1552 = vmatprep.subr.mxu0 %v1938_v0  ;;  %s2566_s15 = smov (!%p478_p13, %s1499_s15), 7  ;;  %v837_v24 = vsub.s32 0, %v836_v20  ;;  %v814_v26 = vsel %vm805_vm6, 16843009, %v1940_v12  ;;  %v798_v50 = vld [vmem:[%s2246_s26 + $0x10] sm:$0xff]  ;;  %v799_v58 = vld [vmem:[%s2246_s26 + $0x18] sm:$0xff] }
  0x9d   : > { %1553 = vmatpush3.msra.mxu0 %v493_v3  ;;  %1554 = vmatprep.mubr.msk.f32.mxu0 %vm1939_vm0, %v1938_v0  ;;  %s480_s30 = scalar_lea.vmem %s2507_s5, %s2566_s15  ;;  %v815_v29 = vunpack.c.0.s8 %v814_v26  ;;  %v495_v26 = vld [vmem:[%s2242_s11] sm:$0xff]  ;;  %v497_v34 = vld [vmem:[%s2242_s11 + $0x10] sm:$0xff]  ;;  %s2372_s12 = sshll.u32 %s2012_s9, 9 }
  0x9e   : > { %1550 = vmatmul.mubr.msk.f32.vlgmr.msra.gmra.mrb[0].mxu1 %vm499_vm1, %v488_v5  ;;  %1557 = vmatprep.subr.mxu1 %v1938_v0  ;;  %v806_v9 = vld [vmem:[%s480_s30] sm:$0x1]  ;;  %v807_v10 = vld [vmem:[%s480_s30 + $0x1] sm:$0x1]  ;;  %v808_v11 = vld [vmem:[%s480_s30 + $0x2] sm:$0x1]  ;;  %s2378_s10 = scalar_lea.hbm %s2509_s7, %s2372_s12  ;;  %s2386_s26 = scalar_lea.hbm %s2510_s8, %s2372_s12 }
  0x9f   : > { %1559 = vmatprep.mubr.msk.f32.mxu1 %vm1939_vm0, %v1938_v0  ;;  %1558 = vmatpush3.msra.mxu1 %v494_v7  ;;  %vm810_vm2 = vnez %v806_v9  ;;  %vm811_vm3 = vnez %v807_v10  ;;  %v809_v14 = vld [vmem:[%s480_s30 + $0x3] sm:$0x1]  ;;  %vm812_vm4 = vnez %v808_v11  ;;  %vm2285_vm11 = vcmp.ne.s32.totalorder %v815_v29, 0  ;;  %s1251_s21 = sshll.u32 %s465_s0, 4  ;;  %s2390_s15 = scalar_lea.sflag [#allocation12], %s389_s18  ;;  %s2380_s21 = int_to_ptr.vmem [resolvable:$true] %s1251_s21 }
  0xa0   : > { %1555 = vmatmul.mubr.msk.f32.vlgmr.msra.gmra.mrb[2].mxu0 %vm499_vm1, %v489_v6  ;;  %1562 = vmatprep.subr.mxu0 %v1938_v0  ;;  %v819_v13 = vsel %vm810_vm2, 16843009, %v1940_v12  ;;  %v820_v16 = vsel %vm811_vm3, 16843009, %v1940_v12  ;;  %vm813_vm5 = vnez %v809_v14  ;;  %v821_v19 = vsel %vm812_vm4, 16843009, %v1940_v12 }
  0xa1   : > { %1564 = vmatprep.mubr.msk.f32.mxu0 %vm1939_vm0, %v1938_v0  ;;  %1567 = vmatprep.subr.mxu1 %v1938_v0  ;;  %v823_v17 = vunpack.c.0.s8 %v819_v13  ;;  %v824_v21 = vunpack.c.0.s8 %v820_v16  ;;  %v822_v22 = vsel %vm813_vm5, 16843009, %v1940_v12  ;;  %v825_v23 = vunpack.c.0.s8 %v821_v19  ;;  %s1796_s17 = scalar_lea.vmem %s2380_s21, 512  ;;  %p2554_p8 = scmp.ne.s32.totalorder %s2531_s16, 0 }
  0xa2   : > { %1560 = vmatmul.mubr.msk.f32.vlgmr.msra.gmra.mrb[2].mxu1 %vm499_vm1, %v490_v8  ;;  %v826_v25 = vunpack.c.0.s8 %v822_v22  ;;  %1563 = vmatpush3.msra.mxu0 %v495_v26  ;;  %p1797_p0 = scmp.ne.s32.totalorder %s2380_s21, %s1796_s17  ;;  %s1941_s29 = smov [#allocation11]  }
  0xa3   : > { %1569 = vmatprep.mubr.msk.f32.mxu1 %vm1939_vm0, %v1938_v0  ;;  %vm827_vm7 = vcmp.ne.s32.totalorder %v823_v17, 0  ;;  %vm828_vm8 = vcmp.ne.s32.totalorder %v824_v21, 0  ;;  %vm829_vm9 = vcmp.ne.s32.totalorder %v825_v23, 0  ;;  %1572 = vmatprep.subr.mxu0 %v1938_v0  ;;  %s1800_s30 = sshll.u32 %s1941_s29, 4  ;;  %s1801_s30 = int_to_ptr.vmem [resolvable:$false] %s1800_s30 }
  0xa4   : > { %v831_v27 = vsel %vm827_vm7, 1, %v1940_v12  ;;  %v832_v28 = vsel %vm828_vm8, 1, %v1940_v12  ;;  %vm830_vm10 = vcmp.ne.s32.totalorder %v826_v25, 0  ;;  %v833_v31 = vsel %vm829_vm9, 1, %v1940_v12  ;;  %p1798_p10 = pnand %p1797_p0, %p2554_p8  ;;  %s1802_s19 = scalar_lea.vmem %s1801_s30, 1024 }
  0xa5   : > { %v838_v30 = vrot.slane %v831_v27, %v837_v24  ;;  %v842_v32 = vrot.slane %v832_v28, %v837_v24  ;;  %v834_v33 = vsel %vm830_vm10, 1, %v1940_v12  ;;  %v846_v36 = vrot.slane %v833_v31, %v837_v24  ;;  %v496_v27 = vld [vmem:[%s2242_s11 + $0x8] sm:$0xff]  ;;  %p1803_p4 = scmp.lt.s32.totalorder %s2380_s21, %s1801_s30  ;;  %p1804_p3 = scmp.lt.s32.totalorder %s1802_s19, %s1796_s17 }
  0xa6   : > { %v850_v42 = vrot.slane %v834_v33, %v837_v24  ;;  %1568 = vmatpush3.msra.mxu1 %v496_v27  ;;  %p1799_p11 = pneg %p1798_p10 }
  0xa7   : > { %vm2289_vm12 = vcmp.eq.s32.totalorder %v838_v30, 1  ;;  %vm2294_vm13 = vcmp.eq.s32.totalorder %v842_v32, 1  ;;  %vm2303_vm15 = vcmp.eq.s32.totalorder %v846_v36, 1  ;;  %1577 = vmatprep.subr.mxu1 %v1938_v0  ;;  %p1805_p5 = por %p1804_p3, %p1803_p4 }
  0xa8   : > { %vm855_vm14 = vmor %vm2285_vm11, %vm2289_vm12  ;;  %vm2312_vm3 = vcmp.eq.s32.totalorder %v850_v42, 1 }
  0xa9   : > { %vm856_vm2 = vmor %vm2285_vm11, %vm2294_vm13  ;;  %p1806_p1 = pnand %p1805_p5, %p1799_p11 }
  0xaa   : > { %vm857_vm4 = vmor %vm2285_vm11, %vm2303_vm15 }
  0xab   : > { %vm858_vm5 = vmor %vm2285_vm11, %vm2312_vm3 }
 0x16f   : > { %v569_v37 = vpop.f32.mrb[0].mxu0 }
 0x170   : > { %v792_v39 = vmul.f32 0.35355338, %v569_v37  ;;  %v1546_v40 = vpop.f32.mrb[1].mxu0 }
 0x171   : > { %v642_v43 = vpop.f32.mrb[0].mxu1 }
 0x172   : > { %v800_v45 = vadd.f32 %v796_v38, %v792_v39  ;;  %v793_v46 = vmul.f32 0.35355338, %v642_v43  ;;  %v1551_v47 = vpop.f32.mrb[1].mxu1  ;;  %v498_v38 = vld [vmem:[%s2242_s11 + $0x18] sm:$0xff] }
 0x173   : > { %v715_v49 = vpop.f32.mrb[2].mxu0 }
 0x174   : > { %v801_v51 = vadd.f32 %v797_v44, %v793_v46  ;;  %v794_v52 = vmul.f32 0.35355338, %v715_v49  ;;  %v1556_v53 = vpop.f32.mrb[3].mxu0  ;;  %v859_v54 = vsel %vm855_vm14, -inf, %v800_v45 }
 0x175   : > { %v867_v56 = vsel %vm499_vm1, %v859_v54, -inf  ;;  %863 = vst.msk [vmem:[%s2318_s20] sm:$0xff] %vm499_vm1, %v859_v54  ;;  %v788_v57 = vpop.f32.mrb[2].mxu1 }
 0x176   : > { %v802_v59 = vadd.f32 %v798_v50, %v794_v52  ;;  %868 = vmax.xlane.f32.xlu0 %v867_v56  ;;  %v795_v60 = vmul.f32 0.35355338, %v788_v57  ;;  %v1561_v61 = vpop.f32.mrb[3].mxu1  ;;  %v860_v62 = vsel %vm856_vm2, -inf, %v801_v51 }
 0x177   : > { %864 = vst.msk [vmem:[%s2318_s20 + $0x8] sm:$0xff] %vm499_vm1, %v860_v62  ;;  %v870_v63 = vsel %vm499_vm1, %v860_v62, -inf }
 0x178   : > { %v803_v1 = vadd.f32 %v799_v58, %v795_v60  ;;  %v861_v2 = vsel %vm857_vm4, -inf, %v802_v59 }
 0x179   : > { %v873_v3 = vsel %vm499_vm1, %v861_v2, -inf  ;;  %865 = vst.msk [vmem:[%s2318_s20 + $0x10] sm:$0xff] %vm499_vm1, %v861_v2 }
 0x17a   : > { %871 = vmax.xlane.f32.xlu0 %v870_v63  ;;  %874 = vmax.xlane.f32.xlu1 %v873_v3  ;;  %v862_v4 = vsel %vm858_vm5, -inf, %v803_v1 }
 0x17b   : > { %866 = vst.msk [vmem:[%s2318_s20 + $0x18] sm:$0xff] %vm499_vm1, %v862_v4  ;;  %v876_v5 = vsel %vm499_vm1, %v862_v4, -inf }
 0x17e   : > { %877 = vmax.xlane.f32.xlu1 %v876_v5 }
 0x203   : > { %v869_v6 = vpop.xlane.xlu0 %868 }
 0x204   : > { %v879_v7 = vsub.f32 %v859_v54, %v869_v6 }
 0x206   : > { %v883_v8 = vmul.f32 1.442695, %v879_v7 }
 0x207   : > { %v872_v9 = vpop.xlane.xlu0 %871  ;;  %v875_v10 = vpop.xlane.xlu1 %874 }
 0x208   : > { %1660 = vpow2.f32 %v883_v8  ;;  %v880_v11 = vsub.f32 %v860_v62, %v872_v9  ;;  %v881_v12 = vsub.f32 %v861_v2, %v875_v10 }
 0x20a   : > { %v885_v13 = vmul.f32 1.442695, %v880_v11  ;;  %v887_v14 = vmul.f32 1.442695, %v881_v12 }
 0x20b   : > { %v878_v15 = vpop.xlane.xlu1 %877 }
 0x20c   : > { %1662 = vpow2.f32 %v885_v13  ;;  %v882_v16 = vsub.f32 %v862_v4, %v878_v15 }
 0x20d   : > { %1664 = vpow2.f32 %v887_v14 }
 0x20e   : > { %v889_v17 = vmul.f32 1.442695, %v882_v16 }
 0x210   : > { %1666 = vpow2.f32 %v889_v17 }
 0x212   : > { %v1661_v18 = vpop.eup %1660 }
 0x213   : > { %v891_v19 = vsel %vm499_vm1, %v1661_v18, 0.0 }
 0x214   : > { %892 = vadd.xlane.f32.xlu0 %v891_v19 }
 0x216   : > { %v1663_v20 = vpop.eup %1662 }
 0x217   : > { %v1665_v21 = vpop.eup %1664  ;;  %v894_v22 = vsel %vm499_vm1, %v1663_v20, 0.0 }
 0x218   : > { %895 = vadd.xlane.f32.xlu1 %v894_v22  ;;  %v897_v23 = vsel %vm499_vm1, %v1665_v21, 0.0 }
 0x219   : > { %898 = vadd.xlane.f32.xlu0 %v897_v23 }
 0x21a   : > { %v1667_v24 = vpop.eup %1666 }
 0x21b   : > { %v900_v25 = vsel %vm499_vm1, %v1667_v24, 0.0 }
 0x21c   : > { %901 = vadd.xlane.f32.xlu1 %v900_v25 }
 0x2a1   : > { %v893_v28 = vpop.xlane.xlu0 %892 }
 0x2a2   : > { %1668 = vrcp.f32 %v893_v28 }
 0x2a5   : > { %v896_v29 = vpop.xlane.xlu1 %895 }
 0x2a6   : > { %v899_v30 = vpop.xlane.xlu0 %898  ;;  %1670 = vrcp.f32 %v896_v29 }
 0x2a7   : > { %1672 = vrcp.f32 %v899_v30 }
 0x2a9   : > { %v902_v31 = vpop.xlane.xlu1 %901 }
 0x2aa   : > { %1674 = vrcp.f32 %v902_v31 }
 0x2ac   : > { %v1669_v32 = vpop.eup %1668 }
 0x2ad   : > { %v907_v33 = vmul.f32 %v1669_v32, %v1661_v18 }
 0x2af   : > { %911 = vst.msk [vmem:[%s465_s0] sm:$0xff] %vm499_vm1, %v907_v33  ;;  %1565 = vmatmul.mubr.msk.f32.vlgmr.msra.gmra.mrb[4].mxu0 %vm499_vm1, %v907_v33 }
 0x2b0   : > { %v1671_v35 = vpop.eup %1670  ;;  %1573 = vmatpush3.msra.mxu0 %v497_v34  ;;  %1574 = vmatprep.mubr.msk.f32.mxu0 %vm1939_vm0, %v1938_v0 }
 0x2b1   : > { %v1673_v36 = vpop.eup %1672  ;;  %v908_v37 = vmul.f32 %v1671_v35, %v1663_v20 }
 0x2b2   : > { %v909_v39 = vmul.f32 %v1673_v36, %v1665_v21 }
 0x2b3   : > { %912 = vst.msk [vmem:[%s465_s0 + $0x8] sm:$0xff] %vm499_vm1, %v908_v37  ;;  %1570 = vmatmul.mubr.msk.f32.vlgmr.msra.gmra.mrb[4].mxu1 %vm499_vm1, %v908_v37 }
 0x2b4   : > { %v1675_v40 = vpop.eup %1674  ;;  %913 = vst.msk [vmem:[%s465_s0 + $0x10] sm:$0xff] %vm499_vm1, %v909_v39  ;;  %1575 = vmatmul.mubr.msk.f32.vlgmr.msra.gmra.mrb[6].mxu0 %vm499_vm1, %v909_v39  ;;  %1578 = vmatpush3.msra.mxu1 %v498_v38 }
 0x2b5   : > { %v910_v41 = vmul.f32 %v1675_v40, %v1667_v24  ;;  %1579 = vmatprep.mubr.msk.f32.mxu1 %vm1939_vm0, %v1938_v0 }
 0x2b7   : > { %914 = vst.msk [vmem:[%s465_s0 + $0x18] sm:$0xff] %vm499_vm1, %v910_v41  ;;  %1580 = vmatmul.mubr.msk.f32.vlgmr.msra.gmra.mrb[6].mxu1 %vm499_vm1, %v910_v41 }
 0x2b8   : > { %1809 = shalt.err (!%p1806_p1)
}
 0x2b9   : > { %s1810_s9 = scalar_lea.hbm %s2378_s10, 512  ;;  %s1814_s20 = scalar_lea.hbm %s2509_s7, 1024 }
 0x2ba   : > { %p1811_p7 = scmp.ne.s32.totalorder %s2378_s10, %s1810_s9  ;;  %p1815_p2 = scmp.lt.u32.totalorder %s2378_s10, %s2509_s7 }
 0x2bb   : > { %p1816_p6 = scmp.lt.u32.totalorder %s1814_s20, %s1810_s9  ;;  %p1818_p0 = scmp.lt.u32.totalorder %s1810_s9, %s2378_s10 }
 0x2bc   : > { %p1812_p9 = pnand %p1811_p7, %p2554_p8 }
 0x2bd   : > { %p1817_p13 = por %p1816_p6, %p1815_p2 }
 0x2be   : > { %p1813_p12 = pneg %p1812_p9 }
 0x2bf   : > { %p1819_p10 = por %p1818_p0, %p1817_p13 }
 0x2c1   : > { %p1820_p11 = pnand %p1819_p10, %p1813_p12 }
 0x2c3   : > { %1823 = shalt.err (!%p1820_p11)
}
 0x2c4   : > { %s1942_s24 = smov 128   ;;  %s1943_s11 = smov 8  }
 0x2c5   : > { %1591 = dma.vmem_to_hbm [thread:$0]  (%p2554_p8), %s2380_s21, 512, %s2378_s10, %s2390_s15, %s1942_s24, %s1942_s24, %s1943_s11  }
 0x2c6   : > { %s1824_s25 = scalar_lea.vmem %s2369_s23, 512  ;;  %s1944_s17 = smov [#allocation13]  }
 0x2c7   : > { %p1825_p4 = scmp.ne.s32.totalorder %s2369_s23, %s1824_s25  ;;  %s1828_s29 = sshll.u32 %s1944_s17, 4  ;;  %s1829_s29 = int_to_ptr.vmem [resolvable:$false] %s1828_s29 }
 0x2c8   : > { %s1830_s30 = scalar_lea.vmem %s1829_s29, 1024  ;;  %p1831_p1 = scmp.lt.s32.totalorder %s2369_s23, %s1829_s29 }
 0x2c9   : > { %p1826_p3 = pnand %p1825_p4, %p2554_p8  ;;  %p1832_p7 = scmp.lt.s32.totalorder %s1830_s30, %s1824_s25 }
 0x2cb   : > { %p1827_p5 = pneg %p1826_p3  ;;  %p1833_p9 = por %p1832_p7, %p1831_p1 }
 0x2cd   : > { %p1834_p12 = pnand %p1833_p9, %p1827_p5 }
 0x2cf   : > { %1837 = shalt.err (!%p1834_p12)
}
 0x2d0   : > { %s1838_s21 = scalar_lea.hbm %s2386_s26, 512  ;;  %s1842_s9 = scalar_lea.hbm %s2510_s8, 1024 }
 0x2d1   : > { %p1839_p2 = scmp.ne.s32.totalorder %s2386_s26, %s1838_s21  ;;  %p1843_p0 = scmp.lt.u32.totalorder %s2386_s26, %s2510_s8 }
 0x2d2   : > { %p1844_p10 = scmp.lt.u32.totalorder %s1842_s9, %s1838_s21  ;;  %p1846_p4 = scmp.lt.u32.totalorder %s1838_s21, %s2386_s26 }
 0x2d3   : > { %p1840_p6 = pnand %p1839_p2, %p2554_p8 }
 0x2d4   : > { %p1845_p11 = por %p1844_p10, %p1843_p0 }
 0x2d5   : > { %p1841_p13 = pneg %p1840_p6 }
 0x2d6   : > { %p1847_p3 = por %p1846_p4, %p1845_p11 }
 0x2d8   : > { %p1848_p5 = pnand %p1847_p3, %p1841_p13 }
 0x2da   : > { %1851 = shalt.err (!%p1848_p5)
}
 0x2db   : > { %1592 = dma.vmem_to_hbm [thread:$0]  (%p2554_p8), %s2369_s23, 512, %s2386_s26, %s2390_s15, %s1942_s24, %s1942_s24, %s1943_s11  }
 0x2dc   : > { %s458_s20 = scalar_lea.vmem [#allocation10], %s2223_s22  ;;  %s2452_s26 = scalar_lea.hbm %s2508_s6, %s2372_s12 }
 0x2dd   : > { %s1235_s0 = sshll.u32 %s458_s20, 4  ;;  %s1212_s15 = scalar_lea.sflag [#allocation4], %s2220_s14  ;;  %s2445_s0 = int_to_ptr.vmem [resolvable:$true] %s1235_s0 }
 0x2de   : > { %s1852_s13 = scalar_lea.vmem %s2445_s0, 512  ;;  %s1945_s25 = smov [#allocation10]  }
 0x2df   : > { %p1853_p1 = scmp.ne.s32.totalorder %s2445_s0, %s1852_s13  ;;  %s1856_s17 = sshll.u32 %s1945_s25, 4  ;;  %s1857_s17 = int_to_ptr.vmem [resolvable:$false] %s1856_s17 }
 0x2e0   : > { %s1858_s29 = scalar_lea.vmem %s1857_s17, 1024  ;;  %p1859_p12 = scmp.lt.s32.totalorder %s2445_s0, %s1857_s17 }
 0x2e1   : > { %p1854_p7 = pnand %p1853_p1, %p2554_p8  ;;  %p1860_p2 = scmp.lt.s32.totalorder %s1858_s29, %s1852_s13 }
 0x2e3   : > { %p1855_p9 = pneg %p1854_p7  ;;  %p1861_p6 = por %p1860_p2, %p1859_p12 }
 0x2e5   : > { %p1862_p13 = pnand %p1861_p6, %p1855_p9 }
 0x382   : > { %v984_v0 = vpop.f32.mrb[4].mxu0 }
 0x383   : > { %1207 = vst.msk [vmem:[%s458_s20] sm:$0xff] %vm499_vm1, %v984_v0  ;;  %v1566_v42 = vpop.f32.mrb[5].mxu0 }
 0x386   : > { %v1057_v43 = vpop.f32.mrb[4].mxu1 }
 0x387   : > { %1208 = vst.msk [vmem:[%s458_s20 + $0x8] sm:$0xff] %vm499_vm1, %v1057_v43  ;;  %v1130_v44 = vpop.f32.mrb[6].mxu0  ;;  %v1571_v45 = vpop.f32.mrb[5].mxu1 }
 0x388   : > { %1209 = vst.msk [vmem:[%s458_s20 + $0x10] sm:$0xff] %vm499_vm1, %v1130_v44  ;;  %v1576_v46 = vpop.f32.mrb[7].mxu0 }
 0x38a   : > { %v1203_v47 = vpop.f32.mrb[6].mxu1 }
 0x38b   : > { %1210 = vst.msk [vmem:[%s458_s20 + $0x18] sm:$0xff] %vm499_vm1, %v1203_v47  ;;  %v1581_v48 = vpop.f32.mrb[7].mxu1 }
 0x38c   : > { %1865 = shalt.err (!%p1862_p13)
}
 0x38d   : > { %s1866_s12 = scalar_lea.hbm %s2452_s26, 512  ;;  %s1870_s10 = scalar_lea.hbm %s2508_s6, 1024 }
 0x38e   : > { %p1867_p0 = scmp.ne.s32.totalorder %s2452_s26, %s1866_s12  ;;  %p1871_p4 = scmp.lt.u32.totalorder %s2452_s26, %s2508_s6 }
 0x38f   : > { %p1872_p3 = scmp.lt.u32.totalorder %s1870_s10, %s1866_s12  ;;  %p1874_p1 = scmp.lt.u32.totalorder %s1866_s12, %s2452_s26 }
 0x390   : > { %p1868_p10 = pnand %p1867_p0, %p2554_p8 }
 0x391   : > { %p1873_p5 = por %p1872_p3, %p1871_p4 }
 0x392   : > { %p1869_p11 = pneg %p1868_p10 }
 0x393   : > { %p1875_p7 = por %p1874_p1, %p1873_p5 }
 0x395   : > { %p1876_p9 = pnand %p1875_p7, %p1869_p11 }
 0x397   : > { %1879 = shalt.err (!%p1876_p9)
}
 0x398   : > { %1590 = dma.vmem_to_hbm [thread:$0]  (%p2554_p8), %s2445_s0, 512, %s2452_s26, %s1212_s15, %s1942_s24, %s1942_s24, %s1943_s11  }
 0x399 PF: > { %s2555_s18 = sld [smem:[#allocation23_spill]]  ;;  %s2556_s1 = sld [smem:[#allocation20_spill]] }
 0x39a   : > { %s1282_s20 = sand.u32 1, %s1918_s27  }
 0x39b   : > { %s1283_s23 = scalar_lea.sflag [#allocation4], %s1282_s20 }
 0x39f   : > { %p2557_p12 = scmp.ne.s32.totalorder %s2555_s18, 0  ;;  %p2558_p2 = scmp.ge.s32.totalorder %s2556_s1, 2 }
 0x3a1   : > { %p1610_p6 = pnand %p2558_p2, %p2557_p12 }
 0x3a3   : > { %1909 = dma.done.wait (!%p1610_p6), %s1283_s23, 512  }
 0x3a4   : > { %1911 = vsyncadd (!%p1610_p6), %s1283_s23, 4294966784  ;;  %s2559_s16 = sadd.s32 4294967294, %s2556_s1  }
 0x3a5   : > { %s1291_s22 = sand.u32 1, %s2559_s16  }
 0x3a6   : > { %s1292_s13 = scalar_lea.sflag [#allocation12], %s1291_s22 }
 0x3a7   : > { %1913 = dma.done.wait (!%p1610_p6), %s1292_s13, 1024  }
 0x3a8   : > { %1915 = vsyncadd (!%p1610_p6), %s1292_s13, 4294966272  ;;  %s2560_s30 = sld [smem:[#allocation21_spill]]  ;;  %s2561_s14 = sld [smem:[#allocation19_spill]] }
 0x3a9   : > { %s2562_s29 = sld [smem:[#allocation22_spill]]  ;;  %s2563_s27 = smov %s1922_s28 }
 0x3ae   : > { %p31_p8 = scmp.ge.s32.totalorder %s2560_s30, 4   ;;  %s2564_s28 = smov %s2561_s14 }
 0x3b0   :  { %33 = sbr.rel (!%p31_p8) target bundleno = 14 (0xe), region = 161 }
 0x3b7   :  { %1306 = vsyncpa [#allocation3], 1 }
 0x3b8   :  { %1308 = vsyncpa [#allocation3 + $0x1], 1 }
 0x3b9   :  { %1309 = vsyncpa [#allocation6], 1 }
 0x3ba   :  { %1311 = vsyncpa [#allocation6 + $0x1], 1 }
 0x3bb   :  { %1312 = vsyncpa [#allocation9], 1 }
 0x3bc   :  { %1314 = vsyncpa [#allocation9 + $0x1], 1 }
 0x3bd   :  { %1315 = vsyncpa [#allocation4], 1 }
 0x3be   :  { %1317 = vsyncpa [#allocation4 + $0x1], 1 }
 0x3bf   :  { %1318 = vsyncpa [#allocation12], 1 }
 0x3c0   :  { %1320 = vsyncpa [#allocation12 + $0x1], 1 }

</bundles_post_ra>
